<compile_context>
chip_gen: v7x
topology: tpu7x:2x2x1
jax: 0.10.0
libtpu: 0.0.40
codegen_flags: <defaults>
</compile_context>

<pallas_src>
import jax
import jax.numpy as jnp
from jax.experimental import pallas as pl
from jax.experimental.pallas import tpu as pltpu


def _metric_queries_kernel(w_ref, q_ref):
    # w_ref: (1, n_q * D)      flattened embedding table, resident in VMEM
    # q_ref: (1, B * n_q * D)  flattened query output, batch tiled along lanes
    # One lane-dense store: weight tiled B times along the lane axis.
    reps = q_ref.shape[1] // w_ref.shape[1]
    q_ref[...] = jnp.tile(w_ref[...], (1, reps))


def metric_queries_forward(src_flatten, query_weight):
    """JAX/Pallas equivalent of MetricQueries.forward.

    Args:
      src_flatten:  (B, L, C) flattened feature tokens (only the batch size is used,
                    matching the PyTorch module).
      query_weight: (N, D) nn.Embedding(2, embed_dim) weight.

    Returns:
      (query, pos_embed, self_attn_mask, box_attn_prior_mask)
    """
    batch_size = src_flatten.shape[0]
    n_q, embed_dim = query_weight.shape
    flat = n_q * embed_dim

    # Lane-dense presentation of the weight: (n_q, D) -> (1, n_q*D).
    w_flat = query_weight.reshape(1, flat)

    in_bytes = flat * query_weight.dtype.itemsize
    out_bytes = batch_size * flat * query_weight.dtype.itemsize

    # NOTE(perf): in production prefer
    #   query = jnp.broadcast_to(query_weight[None], (batch_size, n_q, embed_dim))
    # (zero materialization, folded into the consumer).  The standalone Pallas call
    # below exists only because this module is translated in isolation.
    query_flat = pl.pallas_call(
        _metric_queries_kernel,
        out_shape=jax.ShapeDtypeStruct((1, batch_size * flat), query_weight.dtype),
        # No grid: single invocation, full (tiny) arrays resident in VMEM.
        in_specs=[pl.BlockSpec(memory_space=pltpu.MemorySpace.VMEM)],
        out_specs=pl.BlockSpec(memory_space=pltpu.MemorySpace.VMEM),
        cost_estimate=pl.CostEstimate(
            flops=0, transcendentals=0, bytes_accessed=in_bytes + out_bytes
        ),
    )(w_flat)

    # Layout plumbing back to the module's (B, n_q, D) view (batch varies slowest
    # in the tiled lane order, so a plain reshape is exact).
    query = query_flat.reshape(batch_size, n_q, embed_dim)

    # Constant tensors: produced outside the kernel so XLA can fold/fuse them
    # into downstream consumers instead of burning kernel store bandwidth.
    pos_embed = jnp.zeros((batch_size, n_q, embed_dim), dtype=query_weight.dtype)
    self_attn_mask = jnp.zeros((n_q, n_q), dtype=jnp.bool_)
    box_attn_prior_mask = jnp.zeros((n_q,), dtype=jnp.bool_)
    return query, pos_embed, self_attn_mask, box_attn_prior_mask


if __name__ == "__main__":
    key = jax.random.PRNGKey(0)
    k_w, k_src = jax.random.split(key)

    # Module config (small): input_channels = embed_dim = 32, 2 metric queries.
    batch_size = 2
    embed_dim = 32          # input_channels
    n_queries = 2           # nn.Embedding(2, embed_dim)
    seq_len = 8             # flattened spatial tokens (unused by forward)

    # nn.Embedding default init ~ N(0, 1), deterministic here via PRNGKey(0).
    query_embed_weight = jax.random.normal(k_w, (n_queries, embed_dim), dtype=jnp.float32)
    src_flatten = jax.random.normal(k_src, (batch_size, seq_len, embed_dim), dtype=jnp.float32)

    query, pos_embed, self_attn_mask, box_attn_prior_mask = metric_queries_forward(
        src_flatten, query_embed_weight
    )
    jax.block_until_ready((query, pos_embed, self_attn_mask, box_attn_prior_mask))

    # Reference check against the pure-JAX semantics of the PyTorch forward.
    ref_query = jnp.broadcast_to(query_embed_weight[None], (batch_size, n_queries, embed_dim))
    assert query.shape == (batch_size, n_queries, embed_dim)
    assert pos_embed.shape == (batch_size, n_queries, embed_dim)
    assert self_attn_mask.shape == (n_queries, n_queries) and self_attn_mask.dtype == jnp.bool_
    assert box_attn_prior_mask.shape == (n_queries,) and box_attn_prior_mask.dtype == jnp.bool_
    assert jnp.allclose(query, ref_query)
    assert jnp.allclose(pos_embed, jnp.zeros_like(ref_query))
    assert not bool(jnp.any(self_attn_mask))
    assert not bool(jnp.any(box_attn_prior_mask))

    print("KERNEL_OK")
</pallas_src>

<mosaic_0001>
module attributes {stable_mosaic.version = 11 : i64} {
  func.func @_metric_queries_kernel(%arg0: memref<1x64xf32, #tpu.memory_space<vmem>>, %arg1: memref<1x128xf32, #tpu.memory_space<vmem>>) attributes {dimension_semantics = [], scalar_prefetch = 0 : i64, scratch_operands = 0 : i64, tpu.core_type = #tpu.core_type<tc>} {
    %c0 = arith.constant 0 : index
    %c0_0 = arith.constant 0 : index
    %0 = vector.load %arg0[%c0, %c0_0] : memref<1x64xf32, #tpu.memory_space<vmem>>, vector<1x64xf32>
    %1 = tpu.concatenate %0, %0 in 1 : vector<1x64xf32>, vector<1x64xf32> -> vector<1x128xf32>
    %c0_1 = arith.constant 0 : index
    %c0_2 = arith.constant 0 : index
    %2 = vector.load %arg1[%c0_1, %c0_2] : memref<1x128xf32, #tpu.memory_space<vmem>>, vector<1x128xf32>
    tpu.vector_store %arg1[%c0_1, %c0_2], %1 {strides = array<i32>} : memref<1x128xf32, #tpu.memory_space<vmem>>, vector<1x128xf32>,
    return
  }
}

</mosaic_0001>

<bundles_post_ra>
// kernel: tpu_custom_call.1
= control target key start
LH: loop header
LB: loop body
LE: loop exit
PB: predicated region body
PF: predicated region fallthrough
CT: control target
= control target key end

     0   :  { %6 = vsyncpa [#allocation3], 0  ;;  %s136_s0 = inlined_call_operand.hbm [shape: f32[1,64], index: 0, kind: input, shape index: {}]   ;;  %s137_s1 = inlined_call_operand.hbm [shape: f32[1,128], index: 1, kind: output, shape index: {}]  }
   0x1   :  { %7 = vsyncpa [#allocation4], 0  ;;  %s99_s6 = smov [#allocation2]   ;;  %s51_s10 = scalar_lea.hbm %s136_s0, 16 }
   0x2   :  { %s14_s7 = sshll.u32 %s99_s6, 4  ;;  %p52_p0 = scmp.ne.s32.totalorder %s136_s0, %s51_s10  ;;  %s15_s7 = int_to_ptr.vmem [resolvable:$true] %s14_s7 }
   0x3   :  { %p55_p1 = scmp.lt.u32.totalorder %s51_s10, %s136_s0 }
   0x5   :  { %p57_p2 = pnand %p55_p1, %p52_p0 }
   0x7   :  { %60 = shalt.err (!%p57_p2)
}
   0x8   :  { %s61_s15 = scalar_lea.vmem %s15_s7, 16  ;;  %s65_s16 = scalar_lea.vmem %s15_s7, 32 }
   0x9   :  { %p62_p3 = scmp.ne.s32.totalorder %s15_s7, %s61_s15  ;;  %p66_p4 = scmp.lt.s32.totalorder %s15_s7, %s15_s7 }
   0xa   :  { %p67_p5 = scmp.lt.s32.totalorder %s65_s16, %s61_s15 }
   0xc   :  { %p68_p6 = por %p67_p5, %p66_p4 }
   0xe   :  { %p69_p7 = pnand %p68_p6, %p62_p3 }
  0x10   :  { %72 = shalt.err (!%p69_p7)
}
  0x11   :  { %17 = dma.hbm_to_vmem [thread:$0]  %s136_s0, 16, %s15_s7, [#allocation3]  }
  0x12   :  { %95 = dma.done.wait [#allocation3], 16  }
  0x13   :  { %96 = vsyncadd [#allocation3], 4294967280  ;;  %v23_v0 = vlaneseq  ;;  %v21_v3 = vld [vmem:[#allocation2] sm:$0x1]  ;;  %s100_s19 = smov 64   ;;  %s101_s20 = smov [#allocation5]  }
  0x14   :  { %s39_s21 = sshll.u32 %s101_s20, 4  ;;  %vm30_vm0 = vcmask 523264   ;;  %s40_s21 = int_to_ptr.vmem [resolvable:$true] %s39_s21 }
  0x15   :  { %v24_v1 = vshrl.u32 %v23_v0, 7  ;;  %s73_s22 = scalar_lea.vmem %s40_s21, 16  ;;  %s77_s23 = scalar_lea.vmem %s40_s21, 32 }
  0x16   :  { %p74_p8 = scmp.ne.s32.totalorder %s40_s21, %s73_s22  ;;  %p78_p9 = scmp.lt.s32.totalorder %s40_s21, %s40_s21 }
  0x17   :  { %v25_v2 = vsub.s32 0, %v24_v1  ;;  %p79_p10 = scmp.lt.s32.totalorder %s77_s23, %s73_s22 }
  0x19   :  { %v26_v4 = vrot.slane %v21_v3, %v25_v2  ;;  %p80_p11 = por %p79_p10, %p78_p9 }
  0x1b   :  { %27 = vrot.lane.b32.xlu0 %v26_v4, %s100_s19  ;;  %p81_p12 = pnand %p80_p11, %p74_p8 }
  0x8d   :  { %v28_v5 = vpop.permute.xlu0 %27 }
  0x8e   :  { %v31_v6 = vsel %vm30_vm0, %v21_v3, %v28_v5 }
  0x8f   :  { %32 = vst [vmem:[#allocation5] sm:$0x1] %v31_v6 }
  0x90   :  { %84 = shalt.err (!%p81_p12)
}
  0x91   :  { %s85_s25 = scalar_lea.hbm %s137_s1, 16 }
  0x92   :  { %p86_p13 = scmp.ne.s32.totalorder %s137_s1, %s85_s25  ;;  %p89_p0 = scmp.lt.u32.totalorder %s85_s25, %s137_s1 }
  0x94   :  { %p91_p1 = pnand %p89_p0, %p86_p13 }
  0x96   :  { %94 = shalt.err (!%p91_p1)
}
  0x97   :  { %42 = dma.vmem_to_hbm [thread:$0]  %s40_s21, 16, %s137_s1, [#allocation4]  }
  0x98   :  { %97 = dma.done.wait [#allocation4], 16  }
  0x99   :  { %98 = vsyncadd [#allocation4], 4294967280 }
  0x9a   :  { %46 = vsyncpa [#allocation3], 1 }
  0x9b   :  { %47 = vsyncpa [#allocation4], 1 }

</bundles_post_ra>
